<compile_context>
chip_gen: v6e
topology: v6e:2x2x1
jax: 0.10.0
libtpu: 0.0.40
codegen_flags: <defaults>
</compile_context>

<pallas_src>
import jax
import jax.numpy as jnp
from jax.experimental import pallas as pl
from jax.experimental.pallas import tpu as pltpu  # noqa: F401  (gridless kernel)


# ------------------------------- helpers ------------------------------------ #

def _round_up(v, m):
    return ((v + m - 1) // m) * m


def _full_spec(shape):
    nd = len(shape)
    return pl.BlockSpec(shape, lambda: (0,) * nd)


# ----------------------------- Pallas kernel -------------------------------- #

def _make_fused_gae_kernel(depth, g_layout, w_layout):
    """Fused kernel: whole conv stack (down + up + final linear) in one call.

    g_layout: name -> (row_off, nrows, ncols) into the graph slab.  Names:
              'SA_l' (l=0..depth-2), 'A_last', 'A_last_m', 'AST_l' (l=0..depth-2).
    w_layout: list of (row_off, nrows) for [Wd_0..Wd_{D-1}, Wu_0..Wu_{D-1}, Wlin].
    All offsets/sizes are static Python ints (baked at trace time).
    """

    def kernel(x_ref, g_ref, w_ref, b_ref, o_ref):
        biases = b_ref[...]                                  # (2*depth+1, H) f32

        def g_mat(name):
            r0, nr, nc = g_layout[name]
            return g_ref[r0:r0 + nr, 0:nc]

        def w_mat(idx):
            r0, nr = w_layout[idx]
            return w_ref[r0:r0 + nr, :]

        def conv_relu(a, x, w, b):
            # Keep A on the left so the host-side pool/unpool folds compose.
            # At these shapes either contraction order is the same number of
            # MXU passes — do not "re-optimize" for FLOPs.
            h = jnp.dot(a, x, preferred_element_type=jnp.float32)
            y = jnp.dot(h, w, preferred_element_type=jnp.float32) + b
            return jnp.maximum(y, 0.0)

        x = x_ref[...]                                       # (n0, Cin_pad) f32

        # ---- encoder / down path: pool folded into adjacency (S_l @ A_l) ----
        for l in range(depth - 1):
            x = conv_relu(g_mat(f"SA_{l}"), x, w_mat(l), biases[l:l + 1, :])

        # deepest retained level: plain conv; the pool->unpool sandwich was
        # collapsed into the column-masked adjacency used by the first up conv.
        h = conv_relu(g_mat("A_last"), x, w_mat(depth - 1),
                      biases[depth - 1:depth, :])

        # ---- decoder / up path -------------------------------------------
        x = conv_relu(g_mat("A_last_m"), h, w_mat(depth),
                      biases[depth:depth + 1, :])
        for d in range(1, depth):
            lvl = depth - 1 - d
            # unpool folded into adjacency: AST_lvl = A_lvl @ S_lvl^T
            x = conv_relu(g_mat(f"AST_{lvl}"), x, w_mat(depth + d),
                          biases[depth + d:depth + d + 1, :])

        # ---- final linear --------------------------------------------------
        o_ref[...] = (jnp.dot(x, w_mat(2 * depth),
                              preferred_element_type=jnp.float32)
                      + biases[2 * depth:2 * depth + 1, :])

    return kernel


def fused_gae_forward(x, sa_list, a_last, a_last_m, ast_list,
                      down_w, down_b, up_w, up_b, lin_w, lin_b):
    depth = len(down_w)
    n0, cin = x.shape
    hidden = lin_w.shape[1]
    f32 = jnp.float32

    # --- x: pad feature dim to a multiple of 8 (keeps weight slab 8-aligned) --
    cin_p = _round_up(cin, 8)
    x_p = jnp.zeros((n0, cin_p), f32).at[:, :cin].set(x.astype(f32))

    # --- pack graph matrices into one slab (8-aligned row offsets) -----------
    mats = []
    for l in range(depth - 1):
        mats.append((f"SA_{l}", sa_list[l]))
    mats.append(("A_last", a_last))
    mats.append(("A_last_m", a_last_m))
    for l in range(depth - 1):
        mats.append((f"AST_{l}", ast_list[l]))
    g_cols = max(m.shape[1] for _, m in mats)
    g_layout, chunks, row = {}, [], 0
    for name, m in mats:
        r, c = m.shape
        g_layout[name] = (row, r, c)
        rp = _round_up(r, 8)
        chunks.append(jnp.zeros((rp, g_cols), f32).at[:r, :c].set(m.astype(f32)))
        row += rp
    g_slab = jnp.concatenate(chunks, axis=0)

    # --- pack weights (all have `hidden` columns); pad Wd0's K dim -----------
    wd0 = jnp.zeros((cin_p, hidden), f32).at[:cin, :].set(down_w[0].astype(f32))
    w_mats = [wd0] + [w.astype(f32) for w in down_w[1:]] \
                   + [w.astype(f32) for w in up_w] + [lin_w.astype(f32)]
    w_layout, row = [], 0
    for m in w_mats:
        w_layout.append((row, m.shape[0]))
        row += m.shape[0]
    w_slab = jnp.concatenate(w_mats, axis=0)

    # --- pack biases ----------------------------------------------------------
    b_slab = jnp.stack([b.astype(f32)
                        for b in (list(down_b) + list(up_b) + [lin_b])], axis=0)

    kernel = _make_fused_gae_kernel(depth, g_layout, w_layout)

    return pl.pallas_call(
        kernel,
        out_shape=jax.ShapeDtypeStruct((n0, hidden), jnp.float32),
        in_specs=[_full_spec(x_p.shape), _full_spec(g_slab.shape),
                  _full_spec(w_slab.shape), _full_spec(b_slab.shape)],
        out_specs=_full_spec((n0, hidden)),
    )(x_p, g_slab, w_slab, b_slab)


# ------------------------------ JAX glue ops -------------------------------- #

def knn_adj_norm(pos, k):
    """Dense symmetric kNN graph from positions, GCN-normalized (KnnEdges)."""
    n = pos.shape[0]
    k = min(k, n - 1)
    sq = jnp.sum(pos * pos, axis=-1)
    d2 = sq[:, None] + sq[None, :] - 2.0 * (pos @ pos.T)
    d2 = d2 + jnp.eye(n, dtype=pos.dtype) * 1e9      # exclude self from knn
    _, nbr = jax.lax.top_k(-d2, k)                   # top_k, not full argsort
    a = jnp.zeros((n, n), jnp.float32)
    a = a.at[jnp.arange(n)[:, None], nbr].set(1.0)
    a = jnp.maximum(a, a.T)                          # symmetrize
    a_hat = a + jnp.eye(n, dtype=jnp.float32)        # add self loops
    deg = jnp.sum(a_hat, axis=-1)
    dinv = 1.0 / jnp.sqrt(deg)                       # degree math stays f32
    return a_hat * dinv[:, None] * dinv[None, :]


# --------------------------------- Model ------------------------------------ #

class GAEPallas:
    def __init__(self, in_channels, hidden_channels, depth, pool_ratio=0.25,
                 start_k=6, k_increment=1, seed=0):
        self.in_channels = in_channels
        self.hidden_channels = hidden_channels
        self.depth = depth
        self.pool_ratio = pool_ratio
        self.start_k = start_k
        self.k_increment = k_increment

        key = jax.random.PRNGKey(seed)
        ks = jax.random.split(key, 2 * depth + 2 + depth)
        self.down_w, self.down_b = [], []
        for i in range(depth):
            cin = in_channels if i == 0 else hidden_channels
            self.down_w.append(
                0.1 * jax.random.normal(ks[i], (cin, hidden_channels), jnp.float32))
            self.down_b.append(jnp.zeros((hidden_channels,), jnp.float32))
        self.up_w, self.up_b = [], []
        for i in range(depth):
            self.up_w.append(
                0.1 * jax.random.normal(ks[depth + i],
                                        (hidden_channels, hidden_channels),
                                        jnp.float32))
            self.up_b.append(jnp.zeros((hidden_channels,), jnp.float32))
        self.lin_w = 0.1 * jax.random.normal(
            ks[2 * depth], (hidden_channels, hidden_channels), jnp.float32)
        self.lin_b = 0.01 * jax.random.normal(
            ks[2 * depth + 1], (hidden_channels,), jnp.float32)
        # deterministic keys for 'random' pooling permutations
        self.pool_keys = [ks[2 * depth + 2 + i] for i in range(depth)]

    def forward(self, x, pos):
        depth = self.depth
        # Graph structure / pooling depends only on pos & pool keys (not x).
        # Build everything up-front, fold pool/unpool into the adjacencies,
        # then run one fused Pallas kernel over x.
        sa_list, ast_list = [], []
        a_last = a_last_m = None
        cur_pos = pos
        cur_n = pos.shape[0]
        a = knn_adj_norm(pos, self.start_k)              # level-0 graph
        for i in range(depth):
            num_keep = int(cur_n * self.pool_ratio)      # pool_method == 'random'
            perm = jax.random.permutation(self.pool_keys[i], cur_n)[:num_keep]
            if i < depth - 1:
                sa_list.append(a[perm, :])               # S_i @ A_i (row gather)
                ast_list.append(a[:, perm])              # A_i @ S_i^T (col gather)
                cur_pos = cur_pos[perm]
                cur_n = num_keep
                # KnnEdges on pooled positions, k = start_k + i * k_increment.
                a = knn_adj_norm(cur_pos, self.start_k + i * self.k_increment)
            else:
                # Deepest level: the pool->unpool sandwich S^T S == diag(mask);
                # fold the mask into the adjacency's columns.  The graph at the
                # deepest level is built by the reference but never consumed
                # (use_node_degree=False) -> skipped entirely.
                mask = jnp.zeros((cur_n,), jnp.float32).at[perm].set(1.0)
                a_last = a
                a_last_m = a * mask[None, :]
        return fused_gae_forward(x, sa_list, a_last, a_last_m, ast_list,
                                 self.down_w, self.down_b,
                                 self.up_w, self.up_b,
                                 self.lin_w, self.lin_b)


# ---------------------------------- main ------------------------------------ #

if __name__ == "__main__":
    # small synthetic "batch": 64 nodes, 4 input channels, 3-D positions
    N, C_IN, HIDDEN, DEPTH = 64, 4, 32, 2
    key = jax.random.PRNGKey(0)
    kx, kp = jax.random.split(key)
    x = jax.random.normal(kx, (N, C_IN), jnp.float32)
    pos = jax.random.normal(kp, (N, 3), jnp.float32)

    model = GAEPallas(in_channels=C_IN, hidden_channels=HIDDEN, depth=DEPTH,
                      pool_ratio=0.25, seed=0)
    fwd = jax.jit(model.forward)
    out = jax.block_until_ready(fwd(x, pos))

    assert out.shape == (N, HIDDEN), out.shape
    assert bool(jnp.all(jnp.isfinite(out)))
    print("KERNEL_OK")
</pallas_src>

<mosaic_0001>
module attributes {stable_mosaic.version = 11 : i64} {
  func.func @kernel(%arg0: memref<64x8xf32, #tpu.memory_space<vmem>>, %arg1: memref<112x64xf32, #tpu.memory_space<vmem>>, %arg2: memref<136x32xf32, #tpu.memory_space<vmem>>, %arg3: memref<5x32xf32, #tpu.memory_space<vmem>>, %arg4: memref<64x32xf32, #tpu.memory_space<vmem>>) attributes {dimension_semantics = [], scalar_prefetch = 0 : i64, scratch_operands = 0 : i64, tpu.core_type = #tpu.core_type<tc>} {
    %c0 = arith.constant 0 : index
    %c0_0 = arith.constant 0 : index
    %0 = vector.load %arg3[%c0, %c0_0] : memref<5x32xf32, #tpu.memory_space<vmem>>, vector<5x32xf32>
    %c0_1 = arith.constant 0 : index
    %c0_2 = arith.constant 0 : index
    %1 = vector.load %arg0[%c0_1, %c0_2] : memref<64x8xf32, #tpu.memory_space<vmem>>, vector<64x8xf32>
    %c0_3 = arith.constant 0 : index
    %c0_4 = arith.constant 0 : index
    %2 = vector.load %arg1[%c0_3, %c0_4] : memref<112x64xf32, #tpu.memory_space<vmem>>, vector<16x64xf32>
    %c0_5 = arith.constant 0 : index
    %c0_6 = arith.constant 0 : index
    %3 = vector.load %arg2[%c0_5, %c0_6] : memref<136x32xf32, #tpu.memory_space<vmem>>, vector<8x32xf32>
    %4 = vector.extract_strided_slice %0 {offsets = [0, 0], sizes = [1, 32], strides = [1, 1]} : vector<5x32xf32> to vector<1x32xf32>
    %cst = arith.constant dense<0.000000e+00> : vector<16x8xf32>
    %5 = tpu.matmul %2, %1, %cst {dimension_numbers = #tpu.dot_dimension_numbers<[1], [0], [0], [1], [0, 0, 1, 1], [], []>} : vector<16x64xf32>, vector<64x8xf32>, vector<16x8xf32> -> vector<16x8xf32>
    %cst_7 = arith.constant dense<0.000000e+00> : vector<16x32xf32>
    %6 = tpu.matmul %5, %3, %cst_7 {dimension_numbers = #tpu.dot_dimension_numbers<[1], [0], [0], [1], [0, 0, 1, 1], [], []>} : vector<16x8xf32>, vector<8x32xf32>, vector<16x32xf32> -> vector<16x32xf32>
    %7 = vector.broadcast %4 : vector<1x32xf32> to vector<16x32xf32>
    %8 = arith.addf %6, %7 : vector<16x32xf32>
    %cst_8 = arith.constant 0.000000e+00 : f32
    %9 = vector.broadcast %cst_8 : f32 to vector<16x32xf32>
    %10 = arith.maximumf %8, %9 : vector<16x32xf32>
    %c16 = arith.constant 16 : index
    %c0_9 = arith.constant 0 : index
    %11 = vector.load %arg1[%c16, %c0_9] : memref<112x64xf32, #tpu.memory_space<vmem>>, vector<16x16xf32>
    %c8 = arith.constant 8 : index
    %c0_10 = arith.constant 0 : index
    %12 = vector.load %arg2[%c8, %c0_10] : memref<136x32xf32, #tpu.memory_space<vmem>>, vector<32x32xf32>
    %13 = vector.extract_strided_slice %0 {offsets = [1, 0], sizes = [1, 32], strides = [1, 1]} : vector<5x32xf32> to vector<1x32xf32>
    %cst_11 = arith.constant dense<0.000000e+00> : vector<16x32xf32>
    %14 = tpu.matmul %11, %10, %cst_11 {dimension_numbers = #tpu.dot_dimension_numbers<[1], [0], [0], [1], [0, 0, 1, 1], [], []>} : vector<16x16xf32>, vector<16x32xf32>, vector<16x32xf32> -> vector<16x32xf32>
    %cst_12 = arith.constant dense<0.000000e+00> : vector<16x32xf32>
    %15 = tpu.matmul %14, %12, %cst_12 {dimension_numbers = #tpu.dot_dimension_numbers<[1], [0], [0], [1], [0, 0, 1, 1], [], []>} : vector<16x32xf32>, vector<32x32xf32>, vector<16x32xf32> -> vector<16x32xf32>
    %16 = vector.broadcast %13 : vector<1x32xf32> to vector<16x32xf32>
    %17 = arith.addf %15, %16 : vector<16x32xf32>
    %cst_13 = arith.constant 0.000000e+00 : f32
    %18 = vector.broadcast %cst_13 : f32 to vector<16x32xf32>
    %19 = arith.maximumf %17, %18 : vector<16x32xf32>
    %c32 = arith.constant 32 : index
    %c0_14 = arith.constant 0 : index
    %20 = vector.load %arg1[%c32, %c0_14] : memref<112x64xf32, #tpu.memory_space<vmem>>, vector<16x16xf32>
    %c40 = arith.constant 40 : index
    %c0_15 = arith.constant 0 : index
    %21 = vector.load %arg2[%c40, %c0_15] : memref<136x32xf32, #tpu.memory_space<vmem>>, vector<32x32xf32>
    %22 = vector.extract_strided_slice %0 {offsets = [2, 0], sizes = [1, 32], strides = [1, 1]} : vector<5x32xf32> to vector<1x32xf32>
    %cst_16 = arith.constant dense<0.000000e+00> : vector<16x32xf32>
    %23 = tpu.matmul %20, %19, %cst_16 {dimension_numbers = #tpu.dot_dimension_numbers<[1], [0], [0], [1], [0, 0, 1, 1], [], []>} : vector<16x16xf32>, vector<16x32xf32>, vector<16x32xf32> -> vector<16x32xf32>
    %cst_17 = arith.constant dense<0.000000e+00> : vector<16x32xf32>
    %24 = tpu.matmul %23, %21, %cst_17 {dimension_numbers = #tpu.dot_dimension_numbers<[1], [0], [0], [1], [0, 0, 1, 1], [], []>} : vector<16x32xf32>, vector<32x32xf32>, vector<16x32xf32> -> vector<16x32xf32>
    %25 = vector.broadcast %22 : vector<1x32xf32> to vector<16x32xf32>
    %26 = arith.addf %24, %25 : vector<16x32xf32>
    %cst_18 = arith.constant 0.000000e+00 : f32
    %27 = vector.broadcast %cst_18 : f32 to vector<16x32xf32>
    %28 = arith.maximumf %26, %27 : vector<16x32xf32>
    %c48 = arith.constant 48 : index
    %c0_19 = arith.constant 0 : index
    %29 = vector.load %arg1[%c48, %c0_19] : memref<112x64xf32, #tpu.memory_space<vmem>>, vector<64x16xf32>
    %c72 = arith.constant 72 : index
    %c0_20 = arith.constant 0 : index
    %30 = vector.load %arg2[%c72, %c0_20] : memref<136x32xf32, #tpu.memory_space<vmem>>, vector<32x32xf32>
    %31 = vector.extract_strided_slice %0 {offsets = [3, 0], sizes = [1, 32], strides = [1, 1]} : vector<5x32xf32> to vector<1x32xf32>
    %cst_21 = arith.constant dense<0.000000e+00> : vector<64x32xf32>
    %32 = tpu.matmul %29, %28, %cst_21 {dimension_numbers = #tpu.dot_dimension_numbers<[1], [0], [0], [1], [0, 0, 1, 1], [], []>} : vector<64x16xf32>, vector<16x32xf32>, vector<64x32xf32> -> vector<64x32xf32>
    %cst_22 = arith.constant dense<0.000000e+00> : vector<64x32xf32>
    %33 = tpu.matmul %32, %30, %cst_22 {dimension_numbers = #tpu.dot_dimension_numbers<[1], [0], [0], [1], [0, 0, 1, 1], [], []>} : vector<64x32xf32>, vector<32x32xf32>, vector<64x32xf32> -> vector<64x32xf32>
    %34 = vector.broadcast %31 : vector<1x32xf32> to vector<64x32xf32>
    %35 = arith.addf %33, %34 : vector<64x32xf32>
    %cst_23 = arith.constant 0.000000e+00 : f32
    %36 = vector.broadcast %cst_23 : f32 to vector<64x32xf32>
    %37 = arith.maximumf %35, %36 : vector<64x32xf32>
    %c104 = arith.constant 104 : index
    %c0_24 = arith.constant 0 : index
    %38 = vector.load %arg2[%c104, %c0_24] : memref<136x32xf32, #tpu.memory_space<vmem>>, vector<32x32xf32>
    %cst_25 = arith.constant dense<0.000000e+00> : vector<64x32xf32>
    %39 = tpu.matmul %37, %38, %cst_25 {dimension_numbers = #tpu.dot_dimension_numbers<[1], [0], [0], [1], [0, 0, 1, 1], [], []>} : vector<64x32xf32>, vector<32x32xf32>, vector<64x32xf32> -> vector<64x32xf32>
    %40 = vector.extract_strided_slice %0 {offsets = [4, 0], sizes = [1, 32], strides = [1, 1]} : vector<5x32xf32> to vector<1x32xf32>
    %41 = vector.broadcast %40 : vector<1x32xf32> to vector<64x32xf32>
    %42 = arith.addf %39, %41 : vector<64x32xf32>
    %c0_26 = arith.constant 0 : index
    %c0_27 = arith.constant 0 : index
    %43 = vector.load %arg4[%c0_26, %c0_27] : memref<64x32xf32, #tpu.memory_space<vmem>>, vector<64x32xf32>
    tpu.vector_store %arg4[%c0_26, %c0_27], %42 {strides = array<i32>} : memref<64x32xf32, #tpu.memory_space<vmem>>, vector<64x32xf32>,
    return
  }
}

</mosaic_0001>

<bundles_post_ra>
// kernel: forward.1
= control target key start
LH: loop header
LB: loop body
LE: loop exit
PB: predicated region body
PF: predicated region fallthrough
CT: control target
= control target key end

     0   :  { %vm29_vm0 = vcmask 523264   ;;  %vm115_vm1 = vcmask 64512   ;;  %vm205_vm2 = vcmask 130048   ;;  %v111_v14 = vlaneseq  ;;  %s1424_s0 = inlined_call_operand.vmem [shape: f32[64,8], index: 0, kind: input, shape index: {}]   ;;  %s1425_s1 = inlined_call_operand.vmem [shape: f32[112,64], index: 1, kind: input, shape index: {}]   ;;  %s1426_s2 = inlined_call_operand.vmem [shape: f32[136,32], index: 2, kind: input, shape index: {}]   ;;  %s1427_s3 = inlined_call_operand.vmem [shape: f32[5,32], index: 3, kind: input, shape index: {}]   ;;  %s1428_s4 = inlined_call_operand.vmem [shape: f32[64,32], index: 4, kind: output, shape index: {}]  }
   0x1   :  { %v25_v0 = vld [vmem:[%s1424_s0 + $0x38] sm:$0xff]  ;;  %v24_v1 = vld [vmem:[%s1424_s0 + $0x30] sm:$0xff]  ;;  %v23_v2 = vld [vmem:[%s1424_s0 + $0x28] sm:$0xff]  ;;  %vm291_vm3 = vcmask 261120  }
   0x2   :  { %1083 = vmatprep.subr.mxu0 %v25_v0  ;;  %v26_v3 = vld [vmem:[%s1425_s1] sm:$0xff]  ;;  %v21_v5 = vld [vmem:[%s1424_s0 + $0x18] sm:$0xff]  ;;  %v20_v6 = vld [vmem:[%s1424_s0 + $0x10] sm:$0xff]  ;;  %v1263_v15 = vshrl.u32 %v111_v14, 7 }
   0x3   :  { %1084 = vmatpush3.msra.mxu0 %v25_v0  ;;  %1099 = vmatprep.mubr.msk.f32.mxu0 %vm29_vm0, %v26_v3  ;;  %v22_v4 = vld [vmem:[%s1424_s0 + $0x20] sm:$0xff]  ;;  %v19_v7 = vld [vmem:[%s1424_s0 + $0x8] sm:$0xff]  ;;  %v199_v13 = vld [vmem:[%s1425_s1 + $0x10] sm:$0xff] }
   0x4   :  { %1085 = vmatprep.subr.mxu0 %v24_v1  ;;  %v18_v8 = vld [vmem:[%s1424_s0] sm:$0xff]  ;;  %v27_v9 = vld [vmem:[%s1425_s1 + $0x8] sm:$0xff]  ;;  %1111 = vmatprep.mubr.msk.f32.mxu1 %vm205_vm2, %v199_v13  ;;  %v113_v16 = vsub.s32 0, %v1263_v15  ;;  %v200_v25 = vld [vmem:[%s1425_s1 + $0x18] sm:$0xff]  ;;  %v289_v35 = vsub.s32 1, %v1263_v15  ;;  %v464_v51 = vsub.s32 2, %v1263_v15 }
   0x5   :  { %1086 = vmatpush3.msra.mxu0 %v24_v1  ;;  %v28_v10 = vld [vmem:[%s1426_s2] sm:$0xff]  ;;  %v203_v27 = vld [vmem:[%s1426_s2 + $0x18] sm:$0xff]  ;;  %v202_v28 = vld [vmem:[%s1426_s2 + $0x10] sm:$0xff] }
   0x6   :  { %1087 = vmatprep.subr.mxu0 %v23_v2  ;;  %v1269_v17 = vld [vmem:[%s1427_s3] sm:$0x1f]  ;;  %v201_v29 = vld [vmem:[%s1426_s2 + $0x8] sm:$0xff]  ;;  %v379_v34 = vld [vmem:[%s1426_s2 + $0x38] sm:$0xff] }
   0x7   :  { %1088 = vmatpush3.msra.mxu0 %v23_v2  ;;  %v114_v18 = vrot.slane %v1269_v17, %v113_v16  ;;  %v204_v26 = vld [vmem:[%s1426_s2 + $0x20] sm:$0xff]  ;;  %v290_v36 = vrot.slane %v1269_v17, %v289_v35  ;;  %v376_v43 = vld [vmem:[%s1425_s1 + $0x28] sm:$0xff]  ;;  %v378_v44 = vld [vmem:[%s1426_s2 + $0x30] sm:$0xff]  ;;  %v465_v52 = vrot.slane %v1269_v17, %v464_v51 }
   0x8   :  { %1089 = vmatprep.subr.mxu0 %v22_v4  ;;  %v375_v32 = vld [vmem:[%s1425_s1 + $0x20] sm:$0xff]  ;;  %v377_v45 = vld [vmem:[%s1426_s2 + $0x28] sm:$0xff]  ;;  %v549_v48 = vld [vmem:[%s1425_s1 + $0x30] sm:$0xff] }
   0x9   :  { %1090 = vmatpush3.msra.mxu0 %v22_v4  ;;  %v380_v33 = vld [vmem:[%s1426_s2 + $0x40] sm:$0xff]  ;;  %v559_v50 = vld [vmem:[%s1426_s2 + $0x58] sm:$0xff]  ;;  %v552_v61 = vld [vmem:[%s1425_s1 + $0x48] sm:$0xff] }
   0xa   :  { %1091 = vmatprep.subr.mxu0 %v21_v5  ;;  %v560_v49 = vld [vmem:[%s1426_s2 + $0x60] sm:$0xff]  ;;  %v550_v59 = vld [vmem:[%s1425_s1 + $0x38] sm:$0xff]  ;;  %v553_v62 = vld [vmem:[%s1425_s1 + $0x50] sm:$0xff] }
   0xb   :  { %1092 = vmatpush3.msra.mxu0 %v21_v5  ;;  %v551_v60 = vld [vmem:[%s1425_s1 + $0x40] sm:$0xff]  ;;  %v554_v63 = vld [vmem:[%s1425_s1 + $0x58] sm:$0xff]  ;;  %v556_v1 = vld [vmem:[%s1425_s1 + $0x68] sm:$0xff] }
   0xc   :  { %1093 = vmatprep.subr.mxu0 %v20_v6  ;;  %v555_v0 = vld [vmem:[%s1425_s1 + $0x60] sm:$0xff]  ;;  %v558_v2 = vld [vmem:[%s1426_s2 + $0x50] sm:$0xff]  ;;  %v557_v3 = vld [vmem:[%s1426_s2 + $0x48] sm:$0xff] }
   0xd   :  { %1094 = vmatpush3.msra.mxu0 %v20_v6  ;;  %v834_v4 = vld [vmem:[%s1426_s2 + $0x80] sm:$0xff]  ;;  %v833_v5 = vld [vmem:[%s1426_s2 + $0x78] sm:$0xff]  ;;  %v832_v14 = vld [vmem:[%s1426_s2 + $0x70] sm:$0xff] }
   0xe   :  { %1095 = vmatprep.subr.mxu0 %v19_v7  ;;  %v831_v16 = vld [vmem:[%s1426_s2 + $0x68] sm:$0xff] }
   0xf   :  { %1096 = vmatpush3.msra.mxu0 %v19_v7 }
  0x10   :  { %1097 = vmatprep.subr.mxu0 %v18_v8 }
  0x11   :  { %1098 = vmatpush3.msra.mxu0 %v18_v8 }
  0x12   :  { %1100 = vmatmul.mubr.msk.f32.vlgmr.msra.gmra.mxu0 %vm29_vm0, %v27_v9  ;;  %1102 = vmatprep.subr.mxu0 %v28_v10 }
  0x13   :  { %1103 = vmatpush3.msra.mxu0 %v28_v10 }
  0x14   :  { %1132 = vmatprep.subr.mxu0 %v380_v33 }
  0xd2   :  { %v1101_v11 = vpop.f32.mrf.mxu0 }
  0xd4   :  { %v102_v12 = vpop.f32.mrf.mxu0 }
  0xd5   :  { %1104 = vmatprep.mubr.msk.f32.mxu0 %vm115_vm1, %v102_v12 }
  0xd6   :  { %1105 = vmatmul.mubr.msk.f32.vlgmr.msra.gmra.mxu0 %vm115_vm1, %v1101_v11 }
  0xd7   :  { %1133 = vmatpush3.msra.mxu0 %v380_v33 }
  0xd8   :  { %1134 = vmatprep.subr.mxu0 %v379_v34 }
  0xd9   :  { %1135 = vmatpush3.msra.mxu0 %v379_v34 }
  0xda   :  { %1136 = vmatprep.subr.mxu0 %v378_v44 }
  0xdb   :  { %1137 = vmatpush3.msra.mxu0 %v378_v44  ;;  %v837_v44 = vsub.s32 4, %v1263_v15 }
  0xdc   :  { %1138 = vmatprep.subr.mxu0 %v377_v45 }
  0xdd   :  { %1139 = vmatpush3.msra.mxu0 %v377_v45  ;;  %v838_v45 = vrot.slane %v1269_v17, %v837_v44 }
  0xde   :  { %1159 = vmatprep.subr.mxu0 %v560_v49 }
 0x196   :  { %v1106_v19 = vpop.f32.mrf.mxu0 }
 0x197   :  { %v194_v20 = vadd.f32 %v1106_v19, %v114_v18 }
 0x198   :  { %v188_v21 = vpop.f32.mrf.mxu0 }
 0x199   :  { %v198_v22 = vmax.f32 %v194_v20, 0.0  ;;  %v189_v23 = vadd.f32 %v188_v21, %v114_v18  ;;  %v692_v18 = vsub.s32 3, %v1263_v15 }
 0x19b   :  { %v197_v24 = vmax.f32 %v189_v23, 0.0  ;;  %1107 = vmatprep.subr.mxu1 %v198_v22  ;;  %v693_v19 = vrot.slane %v1269_v17, %v692_v18 }
 0x19c   :  { %1108 = vmatpush3.msra.mxu1 %v198_v22 }
 0x19d   :  { %1109 = vmatprep.subr.mxu1 %v197_v24 }
 0x19e   :  { %1110 = vmatpush3.msra.mxu1 %v197_v24 }
 0x19f   :  { %1112 = vmatmul.mubr.msk.f32.vlgmr.msra.gmra.mxu1 %vm205_vm2, %v200_v25  ;;  %1114 = vmatprep.subr.mxu1 %v204_v26 }
 0x1a0   :  { %1115 = vmatpush3.msra.mxu1 %v204_v26 }
 0x1a1   :  { %1116 = vmatprep.subr.mxu1 %v203_v27 }
 0x1a2   :  { %1117 = vmatpush3.msra.mxu1 %v203_v27 }
 0x1a3   :  { %1118 = vmatprep.subr.mxu1 %v202_v28 }
 0x1a4   :  { %1119 = vmatpush3.msra.mxu1 %v202_v28 }
 0x1a5   :  { %1120 = vmatprep.subr.mxu1 %v201_v29 }
 0x1a6   :  { %1121 = vmatpush3.msra.mxu1 %v201_v29 }
 0x25f   :  { %v1113_v30 = vpop.f32.mrf.mxu1 }
 0x261   :  { %v278_v31 = vpop.f32.mrf.mxu1 }
 0x262   :  { %1122 = vmatprep.mubr.msk.f32.mxu1 %vm291_vm3, %v278_v31 }
 0x263   :  { %1123 = vmatmul.mubr.msk.f32.vlgmr.msra.gmra.mxu1 %vm291_vm3, %v1113_v30 }
 0x264   :  { %1129 = vmatprep.mubr.msk.f32.mxu1 %vm205_vm2, %v375_v32 }
 0x323   :  { %v1124_v37 = vpop.f32.mrf.mxu1 }
 0x324   :  { %v370_v38 = vadd.f32 %v1124_v37, %v290_v36 }
 0x325   :  { %v364_v39 = vpop.f32.mrf.mxu1 }
 0x326   :  { %v374_v40 = vmax.f32 %v370_v38, 0.0  ;;  %v365_v41 = vadd.f32 %v364_v39, %v290_v36 }
 0x328   :  { %v373_v42 = vmax.f32 %v365_v41, 0.0  ;;  %1125 = vmatprep.subr.mxu1 %v374_v40 }
 0x329   :  { %1126 = vmatpush3.msra.mxu1 %v374_v40 }
 0x32a   :  { %1127 = vmatprep.subr.mxu1 %v373_v42 }
 0x32b   :  { %1128 = vmatpush3.msra.mxu1 %v373_v42 }
 0x32c   :  { %1130 = vmatmul.mubr.msk.f32.vlgmr.msra.gmra.mxu1 %vm205_vm2, %v376_v43 }
 0x32d   :  { %1147 = vmatprep.mubr.msk.f32.mxu1 %vm205_vm2, %v549_v48 }
 0x3ec   :  { %v1131_v46 = vpop.f32.mrf.mxu1 }
 0x3ee   :  { %v453_v47 = vpop.f32.mrf.mxu1 }
 0x3ef   :  { %1140 = vmatprep.mubr.msk.f32.mxu0 %vm291_vm3, %v453_v47 }
 0x3f0   :  { %1141 = vmatmul.mubr.msk.f32.vlgmr.msra.gmra.mxu0 %vm291_vm3, %v1131_v46 }
 0x3f1   :  { %1160 = vmatpush3.msra.mxu0 %v560_v49 }
 0x3f2   :  { %1161 = vmatprep.subr.mxu0 %v559_v50 }
 0x3f3   :  { %1162 = vmatpush3.msra.mxu0 %v559_v50 }
 0x3f4   :  { %1163 = vmatprep.subr.mxu0 %v558_v2 }
 0x3f5   :  { %1164 = vmatpush3.msra.mxu0 %v558_v2 }
 0x3f6   :  { %1165 = vmatprep.subr.mxu0 %v557_v3 }
 0x3f7   :  { %1166 = vmatpush3.msra.mxu0 %v557_v3 }
 0x4b0   :  { %v1142_v53 = vpop.f32.mrf.mxu0 }
 0x4b1   :  { %v544_v54 = vadd.f32 %v1142_v53, %v465_v52 }
 0x4b2   :  { %v538_v55 = vpop.f32.mrf.mxu0 }
 0x4b3   :  { %v548_v56 = vmax.f32 %v544_v54, 0.0  ;;  %v539_v57 = vadd.f32 %v538_v55, %v465_v52 }
 0x4b5   :  { %v547_v58 = vmax.f32 %v539_v57, 0.0  ;;  %1143 = vmatprep.subr.mxu1 %v548_v56 }
 0x4b6   :  { %1144 = vmatpush3.msra.mxu1 %v548_v56 }
 0x4b7   :  { %1145 = vmatprep.subr.mxu1 %v547_v58 }
 0x4b8   :  { %1146 = vmatpush3.msra.mxu1 %v547_v58 }
 0x4b9   :  { %1148 = vmatmul.mubr.msk.f32.vlgmr.msra.gmra.mxu1 %vm205_vm2, %v550_v59  ;;  %1179 = vmatprep.subr.mxu1 %v834_v4 }
 0x4ba   :  { %1150 = vmatprep.mubr.msk.f32.mxu1 %vm205_vm2, %v551_v60  ;;  %1180 = vmatpush3.msra.mxu1 %v834_v4 }
 0x4bb   :  { %1181 = vmatprep.subr.mxu1 %v833_v5 }
 0x4bc   :  { %1182 = vmatpush3.msra.mxu1 %v833_v5 }
 0x4bd   :  { %1151 = vmatmul.mubr.msk.f32.gmra.mxu1 %vm205_vm2, %v552_v61  ;;  %1183 = vmatprep.subr.mxu1 %v832_v14 }
 0x4be   :  { %1153 = vmatprep.mubr.msk.f32.mxu1 %vm205_vm2, %v553_v62  ;;  %1184 = vmatpush3.msra.mxu1 %v832_v14 }
 0x4bf   :  { %1185 = vmatprep.subr.mxu1 %v831_v16 }
 0x4c0   :  { %1186 = vmatpush3.msra.mxu1 %v831_v16 }
 0x4c1   :  { %1154 = vmatmul.mubr.msk.f32.gmra.mxu1 %vm205_vm2, %v554_v63 }
 0x4c2   :  { %1156 = vmatprep.mubr.msk.f32.mxu1 %vm205_vm2, %v555_v0 }
 0x4c5   :  { %1157 = vmatmul.mubr.msk.f32.gmra.mxu1 %vm205_vm2, %v556_v1 }
 0x579   :  { %v1149_v6 = vpop.f32.mrf.mxu1 }
 0x57b   :  { %v651_v7 = vpop.f32.mrf.mxu1 }
 0x57c   :  { %1167 = vmatprep.mubr.msk.f32.mxu0 %vm291_vm3, %v651_v7 }
 0x57d   :  { %v1152_v8 = vpop.f32.mrf.mxu1  ;;  %1168 = vmatmul.mubr.msk.f32.vlgmr.msra.gmra.mxu0 %vm291_vm3, %v1149_v6 }
 0x57f   :  { %v661_v9 = vpop.f32.mrf.mxu1 }
 0x580   :  { %1170 = vmatprep.mubr.msk.f32.mxu0 %vm291_vm3, %v661_v9 }
 0x581   :  { %v1155_v10 = vpop.f32.mrf.mxu1  ;;  %1171 = vmatmul.mubr.msk.f32.gmra.mxu0 %vm291_vm3, %v1152_v8 }
 0x583   :  { %v671_v11 = vpop.f32.mrf.mxu1 }
 0x584   :  { %1173 = vmatprep.mubr.msk.f32.mxu0 %vm291_vm3, %v671_v11 }
 0x585   :  { %v1158_v12 = vpop.f32.mrf.mxu1  ;;  %1174 = vmatmul.mubr.msk.f32.gmra.mxu0 %vm291_vm3, %v1155_v10 }
 0x587   :  { %v681_v13 = vpop.f32.mrf.mxu1 }
 0x588   :  { %1176 = vmatprep.mubr.msk.f32.mxu0 %vm291_vm3, %v681_v13 }
 0x589   :  { %1177 = vmatmul.mubr.msk.f32.gmra.mxu0 %vm291_vm3, %v1158_v12 }
 0x63d   :  { %v1169_v20 = vpop.f32.mrf.mxu0 }
 0x63e   :  { %v790_v21 = vadd.f32 %v1169_v20, %v693_v19 }
 0x63f   :  { %v784_v22 = vpop.f32.mrf.mxu0 }
 0x640   :  { %v785_v23 = vadd.f32 %v784_v22, %v693_v19  ;;  %v824_v26 = vmax.f32 %v790_v21, 0.0 }
 0x641   :  { %v1172_v24 = vpop.f32.mrf.mxu0 }
 0x642   :  { %v823_v25 = vmax.f32 %v785_v23, 0.0  ;;  %v800_v27 = vadd.f32 %v1172_v24, %v693_v19 }
 0x643   :  { %v794_v28 = vpop.f32.mrf.mxu0 }
 0x644   :  { %v795_v29 = vadd.f32 %v794_v28, %v693_v19  ;;  %1187 = vmatprep.mubr.msk.f32.mxu1 %vm291_vm3, %v823_v25  ;;  %v826_v32 = vmax.f32 %v800_v27, 0.0 }
 0x645   :  { %v1175_v30 = vpop.f32.mrf.mxu0  ;;  %1188 = vmatmul.mubr.msk.f32.vlgmr.msra.gmra.mxu1 %vm291_vm3, %v824_v26 }
 0x646   :  { %v825_v31 = vmax.f32 %v795_v29, 0.0  ;;  %v810_v33 = vadd.f32 %v1175_v30, %v693_v19 }
 0x647   :  { %v804_v34 = vpop.f32.mrf.mxu0 }
 0x648   :  { %v805_v35 = vadd.f32 %v804_v34, %v693_v19  ;;  %1190 = vmatprep.mubr.msk.f32.mxu1 %vm291_vm3, %v825_v31  ;;  %v828_v38 = vmax.f32 %v810_v33, 0.0 }
 0x649   :  { %v1178_v36 = vpop.f32.mrf.mxu0  ;;  %1191 = vmatmul.mubr.msk.f32.gmra.mxu1 %vm291_vm3, %v826_v32 }
 0x64a   :  { %v827_v37 = vmax.f32 %v805_v35, 0.0  ;;  %v820_v39 = vadd.f32 %v1178_v36, %v693_v19 }
 0x64b   :  { %v814_v40 = vpop.f32.mrf.mxu0 }
 0x64c   :  { %v815_v41 = vadd.f32 %v814_v40, %v693_v19  ;;  %1193 = vmatprep.mubr.msk.f32.mxu1 %vm291_vm3, %v827_v37  ;;  %v830_v43 = vmax.f32 %v820_v39, 0.0 }
 0x64d   :  { %1194 = vmatmul.mubr.msk.f32.gmra.mxu1 %vm291_vm3, %v828_v38 }
 0x64e   :  { %v829_v42 = vmax.f32 %v815_v41, 0.0 }
 0x650   :  { %1196 = vmatprep.mubr.msk.f32.mxu1 %vm291_vm3, %v829_v42 }
 0x651   :  { %1197 = vmatmul.mubr.msk.f32.gmra.mxu1 %vm291_vm3, %v830_v43 }
 0x705   :  { %v1189_v46 = vpop.f32.mrf.mxu1 }
 0x706   :  { %v935_v47 = vadd.f32 %v1189_v46, %v838_v45 }
 0x707   :  { %v929_v48 = vpop.f32.mrf.mxu1 }
 0x708   :  { %969 = vst.msk [vmem:[%s1428_s4 + $0x8] sm:$0xff] %vm291_vm3, %v935_v47  ;;  %v930_v49 = vadd.f32 %v929_v48, %v838_v45 }
 0x709   :  { %v1192_v50 = vpop.f32.mrf.mxu1 }
 0x70a   :  { %968 = vst.msk [vmem:[%s1428_s4] sm:$0xff] %vm291_vm3, %v930_v49  ;;  %v945_v51 = vadd.f32 %v1192_v50, %v838_v45 }
 0x70b   :  { %v939_v52 = vpop.f32.mrf.mxu1 }
 0x70c   :  { %971 = vst.msk [vmem:[%s1428_s4 + $0x18] sm:$0xff] %vm291_vm3, %v945_v51  ;;  %v940_v15 = vadd.f32 %v939_v52, %v838_v45 }
 0x70d   :  { %v1195_v17 = vpop.f32.mrf.mxu1 }
 0x70e   :  { %970 = vst.msk [vmem:[%s1428_s4 + $0x10] sm:$0xff] %vm291_vm3, %v940_v15  ;;  %v955_v53 = vadd.f32 %v1195_v17, %v838_v45 }
 0x70f   :  { %v949_v54 = vpop.f32.mrf.mxu1 }
 0x710   :  { %973 = vst.msk [vmem:[%s1428_s4 + $0x28] sm:$0xff] %vm291_vm3, %v955_v53  ;;  %v950_v55 = vadd.f32 %v949_v54, %v838_v45 }
 0x711   :  { %v1198_v56 = vpop.f32.mrf.mxu1 }
 0x712   :  { %972 = vst.msk [vmem:[%s1428_s4 + $0x20] sm:$0xff] %vm291_vm3, %v950_v55  ;;  %v965_v57 = vadd.f32 %v1198_v56, %v838_v45 }
 0x713   :  { %v959_v58 = vpop.f32.mrf.mxu1 }
 0x714   :  { %975 = vst.msk [vmem:[%s1428_s4 + $0x38] sm:$0xff] %vm291_vm3, %v965_v57  ;;  %v960_v59 = vadd.f32 %v959_v58, %v838_v45 }
 0x716   :  { %974 = vst.msk [vmem:[%s1428_s4 + $0x30] sm:$0xff] %vm291_vm3, %v960_v59 }

</bundles_post_ra>
